<compile_context>
chip_gen: v6e
topology: v6e:2x2x1
jax: 0.10.0
libtpu: 0.0.40
codegen_flags: <defaults>
</compile_context>

<pallas_src>
import functools

import jax
import jax.numpy as jnp
from jax.experimental import pallas as pl
from jax.experimental.pallas import tpu as pltpu

LANE = 128  # pad stored feature dims to a multiple of the lane width


def _round_up(v, m):
    return ((v + m - 1) // m) * m


def _pad_cols(m, width):
    """Zero-pad the last dim of a 2-D array up to `width`."""
    pad = width - m.shape[-1]
    if pad <= 0:
        return m
    return jnp.pad(m, ((0, 0), (0, pad)))


# ---------------------------------------------------------------------------
# Fused kernel: both GCN layers in one pallas_call (A_hat read from HBM once).
# ---------------------------------------------------------------------------
def gcn_fused_kernel(a_ref, x_ref, w1_ref, b1_ref, w2_ref, b2_ref, o_ref, h_ref):
    # ---- layer 1, aggregate-first (F_in <= hidden): (A_hat @ x) @ W1 ----
    ax = jnp.dot(a_ref[...], x_ref[...], preferred_element_type=jnp.float32)
    h = jnp.dot(ax.astype(jnp.bfloat16), w1_ref[...],
                preferred_element_type=jnp.float32) + b1_ref[...]
    h_ref[...] = jnp.maximum(h, 0.0).astype(jnp.bfloat16)  # h stays in VMEM

    # ---- layer 2, aggregate-first: (A_hat @ h) @ W2_pad ----
    ah = jnp.dot(a_ref[...], h_ref[...], preferred_element_type=jnp.float32)
    out = jnp.dot(ah.astype(jnp.bfloat16), w2_ref[...],
                  preferred_element_type=jnp.float32) + b2_ref[...]
    o_ref[...] = out  # (N, 128) lane-dense f32 slab


def gcn_forward_fused(a_hat_bf16, x_bf16, w1, b1, w2_pad, b2_pad, hidden):
    n = x_bf16.shape[0]
    out_pad = w2_pad.shape[1]
    in_specs = [pl.BlockSpec(memory_space=pltpu.MemorySpace.VMEM) for _ in range(6)]
    return pl.pallas_call(
        gcn_fused_kernel,
        out_shape=jax.ShapeDtypeStruct((n, out_pad), jnp.float32),
        in_specs=in_specs,
        out_specs=pl.BlockSpec(memory_space=pltpu.MemorySpace.VMEM),
        scratch_shapes=[pltpu.VMEM((n, hidden), jnp.bfloat16)],
        compiler_params=pltpu.CompilerParams(
            # 32 MiB is the default on v6e/v7x and safely below physical VMEM on
            # every generation; raises v5e's 16 MiB default.
            vmem_limit_bytes=32 * 1024 * 1024),
    )(a_hat_bf16, x_bf16, w1, b1, w2_pad, b2_pad)


# ---------------------------------------------------------------------------
# Row-tiled per-layer kernel (scalable fallback when A_hat won't fit VMEM).
# ---------------------------------------------------------------------------
def gcn_layer_tiled_kernel(a_ref, x_ref, w_ref, b_ref, o_ref, *, apply_relu):
    # Aggregate-first: (A_tile @ x) @ W -- the big (tm x N) matmul runs against
    # the narrow input feature width, not the 128-padded output width.
    ax = jnp.dot(a_ref[...], x_ref[...], preferred_element_type=jnp.float32)
    out = jnp.dot(ax.astype(jnp.bfloat16), w_ref[...],
                  preferred_element_type=jnp.float32) + b_ref[...]
    if apply_relu:
        out = jnp.maximum(out, 0.0)
    o_ref[...] = out.astype(o_ref.dtype)


def gcn_layer_tiled(a_hat_bf16, x_bf16, w_pad, b_pad, *, apply_relu, out_dtype,
                    row_tile):
    n, f_in = x_bf16.shape
    f_out = w_pad.shape[1]
    tm = row_tile
    assert n % tm == 0 and (tm == n or tm % 8 == 0)
    return pl.pallas_call(
        functools.partial(gcn_layer_tiled_kernel, apply_relu=apply_relu),
        out_shape=jax.ShapeDtypeStruct((n, f_out), out_dtype),
        grid=(n // tm,),
        in_specs=[
            pl.BlockSpec((tm, n), lambda i: (i, 0)),        # A_hat row tile
            pl.BlockSpec((n, f_in), lambda i: (0, 0)),      # x (resident)
            pl.BlockSpec((f_in, f_out), lambda i: (0, 0)),  # W (resident)
            pl.BlockSpec((1, f_out), lambda i: (0, 0)),     # bias (resident)
        ],
        out_specs=pl.BlockSpec((tm, f_out), lambda i: (i, 0)),
        compiler_params=pltpu.CompilerParams(
            dimension_semantics=("parallel",),  # v7x: 2 TCs split the row tiles
            vmem_limit_bytes=32 * 1024 * 1024),
    )(a_hat_bf16, x_bf16, w_pad, b_pad)


def _pick_row_tile(n, *, max_tile_rows=512, max_tile_bytes=4 * 1024 * 1024):
    """Largest row tile that divides N, is a multiple of 8, and keeps a bf16
    (tm, N) A_hat block under ~4 MiB so the double-buffered pipeline fits the
    default scoped VMEM on every TPU generation (incl. v7x's 64 MiB total)."""
    if n <= max_tile_rows:
        return n
    cap = min(max_tile_rows, max(8, max_tile_bytes // (2 * n)))
    cap -= cap % 8
    for t in range(cap, 7, -8):
        if n % t == 0:
            return t
    # TODO(synk): pad N up to a tile multiple instead of falling back to full rows.
    return n


# ---------------------------------------------------------------------------
# Plain-JAX glue: dense normalized adjacency + parameter init + forward.
# ---------------------------------------------------------------------------
def build_normalized_adjacency(edge_index, num_nodes):
    """Dense A_hat = D^{-1/2} (A + I) D^{-1/2}, A[dst, src] = 1 per edge.
    Note: duplicate edges are deduplicated (.set), matching the original
    kernel; PyG would scatter-add duplicates."""
    src = edge_index[0]
    dst = edge_index[1]
    adj = jnp.zeros((num_nodes, num_nodes), dtype=jnp.float32)
    adj = adj.at[dst, src].set(1.0)
    adj = adj + jnp.eye(num_nodes, dtype=jnp.float32)  # self-loops
    deg = adj.sum(axis=1)
    dinv = jax.lax.rsqrt(jnp.maximum(deg, 1e-12))
    return dinv[:, None] * adj * dinv[None, :]


def gcn_forward(x, edge_index, params, *, force_tiled=False, row_tile=None,
                fused_a_budget_bytes=8 * 1024 * 1024):
    """forward: relu(conv1(x, edge_index)) -> conv2(., edge_index)."""
    n = x.shape[0]
    hidden = params["w1"].shape[1]
    out_dim = params["w2"].shape[1]
    out_pad = _round_up(out_dim, LANE)   # lane-dense final store
    hid_pad = _round_up(hidden, LANE)    # lane-dense h store (tiled path only)

    a_hat = build_normalized_adjacency(edge_index, n).astype(jnp.bfloat16)
    x_bf16 = x.astype(jnp.bfloat16)
    b1 = params["b1"].reshape(1, hidden).astype(jnp.float32)
    b2 = params["b2"].reshape(1, out_dim).astype(jnp.float32)

    use_fused = (not force_tiled) and (2 * n * n <= fused_a_budget_bytes)
    if use_fused:
        w1 = params["w1"].astype(jnp.bfloat16)
        w2p = _pad_cols(params["w2"], out_pad).astype(jnp.bfloat16)
        b2p = _pad_cols(b2, out_pad)
        out = gcn_forward_fused(a_hat, x_bf16, w1, b1, w2p, b2p, hidden)
    else:
        tm = row_tile if row_tile is not None else _pick_row_tile(n)
        # Pad hidden so layer-1's HBM store of h is lane-dense; padded columns
        # are relu(0 + 0) = 0 and W2's padded rows are 0 -> mathematically exact.
        w1p = _pad_cols(params["w1"], hid_pad).astype(jnp.bfloat16)
        b1p = _pad_cols(b1, hid_pad)
        w2p = jnp.zeros((hid_pad, out_pad), jnp.float32)
        w2p = w2p.at[:hidden, :out_dim].set(params["w2"]).astype(jnp.bfloat16)
        b2p = _pad_cols(b2, out_pad)
        h = gcn_layer_tiled(a_hat, x_bf16, w1p, b1p, apply_relu=True,
                            out_dtype=jnp.bfloat16, row_tile=tm)
        out = gcn_layer_tiled(a_hat, h, w2p, b2p, apply_relu=False,
                              out_dtype=jnp.float32, row_tile=tm)
    return out[:, :out_dim]


def init_params(key, input_dim, hidden_dim=16, output_dim=1):
    k1, k2 = jax.random.split(key)

    def glorot(k, fan_in, fan_out):
        lim = jnp.sqrt(6.0 / (fan_in + fan_out))
        return jax.random.uniform(k, (fan_in, fan_out), jnp.float32, -lim, lim)

    return {
        "w1": glorot(k1, input_dim, hidden_dim),
        "b1": jnp.zeros((hidden_dim,), jnp.float32),
        "w2": glorot(k2, hidden_dim, output_dim),
        "b2": jnp.zeros((output_dim,), jnp.float32),
    }


def gcn_reference(x, edge_index, params):
    """Pure-JAX f32 reference for the whole forward pass."""
    a_hat = build_normalized_adjacency(edge_index, x.shape[0])
    h = jnp.maximum(a_hat @ (x @ params["w1"]) + params["b1"], 0.0)
    return a_hat @ (h @ params["w2"]) + params["b2"]


if __name__ == "__main__":
    key = jax.random.PRNGKey(0)

    def ring_edges(num_nodes):
        idx = jnp.arange(num_nodes, dtype=jnp.int32)
        src = jnp.concatenate([idx, (idx + 1) % num_nodes])
        dst = jnp.concatenate([(idx + 1) % num_nodes, idx])
        return jnp.stack([src, dst], axis=0)  # (2, 2N)

    input_dim, hidden_dim, output_dim = 4, 16, 1
    k_x1, k_p, k_x2 = jax.random.split(key, 3)
    params = init_params(k_p, input_dim, hidden_dim, output_dim)

    # --- Case 1: small graph -> fused single-kernel path (A_hat read once). ---
    n1 = 16
    x1 = jax.random.normal(k_x1, (n1, input_dim), dtype=jnp.float32)
    e1 = ring_edges(n1)
    out1 = jax.block_until_ready(gcn_forward(x1, e1, params))
    ref1 = gcn_reference(x1, e1, params)
    assert out1.shape == (n1, output_dim)
    assert jnp.allclose(out1, ref1, atol=3e-2, rtol=3e-2), float(
        jnp.max(jnp.abs(out1 - ref1)))

    # --- Case 2: larger graph -> row-tiled grid path (2 tiles, parallel axis). ---
    n2 = 256
    x2 = jax.random.normal(k_x2, (n2, input_dim), dtype=jnp.float32)
    e2 = ring_edges(n2)
    out2 = jax.block_until_ready(
        gcn_forward(x2, e2, params, force_tiled=True, row_tile=128))
    ref2 = gcn_reference(x2, e2, params)
    assert out2.shape == (n2, output_dim)
    assert jnp.allclose(out2, ref2, atol=3e-2, rtol=3e-2), float(
        jnp.max(jnp.abs(out2 - ref2)))

    print("KERNEL_OK")
</pallas_src>

<mosaic_0001>
module attributes {stable_mosaic.version = 11 : i64} {
  func.func @gcn_fused_kernel(%arg0: memref<16x16xbf16, #tpu.memory_space<vmem>>, %arg1: memref<16x4xbf16, #tpu.memory_space<vmem>>, %arg2: memref<4x16xbf16, #tpu.memory_space<vmem>>, %arg3: memref<1x16xf32, #tpu.memory_space<vmem>>, %arg4: memref<16x128xbf16, #tpu.memory_space<vmem>>, %arg5: memref<1x128xf32, #tpu.memory_space<vmem>>, %arg6: memref<16x128xf32, #tpu.memory_space<vmem>>, %arg7: memref<16x16xbf16, #tpu.memory_space<vmem>>) attributes {dimension_semantics = [], scalar_prefetch = 0 : i64, scratch_operands = 1 : i64, tpu.core_type = #tpu.core_type<tc>} {
    %c0 = arith.constant 0 : index
    %c0_0 = arith.constant 0 : index
    %0 = vector.load %arg0[%c0, %c0_0] : memref<16x16xbf16, #tpu.memory_space<vmem>>, vector<16x16xbf16>
    %c0_1 = arith.constant 0 : index
    %c0_2 = arith.constant 0 : index
    %1 = vector.load %arg1[%c0_1, %c0_2] : memref<16x4xbf16, #tpu.memory_space<vmem>>, vector<16x4xbf16>
    %cst = arith.constant dense<0.000000e+00> : vector<16x4xf32>
    %2 = tpu.matmul %0, %1, %cst {dimension_numbers = #tpu.dot_dimension_numbers<[1], [0], [0], [1], [0, 0, 1, 1], [], []>} : vector<16x16xbf16>, vector<16x4xbf16>, vector<16x4xf32> -> vector<16x4xf32>
    %3 = arith.truncf %2 : vector<16x4xf32> to vector<16x4xbf16>
    %c0_3 = arith.constant 0 : index
    %c0_4 = arith.constant 0 : index
    %4 = vector.load %arg2[%c0_3, %c0_4] : memref<4x16xbf16, #tpu.memory_space<vmem>>, vector<4x16xbf16>
    %cst_5 = arith.constant dense<0.000000e+00> : vector<16x16xf32>
    %5 = tpu.matmul %3, %4, %cst_5 {dimension_numbers = #tpu.dot_dimension_numbers<[1], [0], [0], [1], [0, 0, 1, 1], [], []>} : vector<16x4xbf16>, vector<4x16xbf16>, vector<16x16xf32> -> vector<16x16xf32>
    %c0_6 = arith.constant 0 : index
    %c0_7 = arith.constant 0 : index
    %6 = vector.load %arg3[%c0_6, %c0_7] : memref<1x16xf32, #tpu.memory_space<vmem>>, vector<1x16xf32>
    %7 = vector.broadcast %6 : vector<1x16xf32> to vector<16x16xf32>
    %8 = arith.addf %5, %7 : vector<16x16xf32>
    %cst_8 = arith.constant 0.000000e+00 : f32
    %9 = vector.broadcast %cst_8 : f32 to vector<16x16xf32>
    %10 = arith.maximumf %8, %9 : vector<16x16xf32>
    %11 = arith.truncf %10 : vector<16x16xf32> to vector<16x16xbf16>
    %c0_9 = arith.constant 0 : index
    %c0_10 = arith.constant 0 : index
    %12 = vector.load %arg7[%c0_9, %c0_10] : memref<16x16xbf16, #tpu.memory_space<vmem>>, vector<16x16xbf16>
    tpu.vector_store %arg7[%c0_9, %c0_10], %11 {strides = array<i32>} : memref<16x16xbf16, #tpu.memory_space<vmem>>, vector<16x16xbf16>,
    %c0_11 = arith.constant 0 : index
    %c0_12 = arith.constant 0 : index
    %13 = vector.load %arg0[%c0_11, %c0_12] : memref<16x16xbf16, #tpu.memory_space<vmem>>, vector<16x16xbf16>
    %c0_13 = arith.constant 0 : index
    %c0_14 = arith.constant 0 : index
    %14 = vector.load %arg7[%c0_13, %c0_14] : memref<16x16xbf16, #tpu.memory_space<vmem>>, vector<16x16xbf16>
    %cst_15 = arith.constant dense<0.000000e+00> : vector<16x16xf32>
    %15 = tpu.matmul %13, %14, %cst_15 {dimension_numbers = #tpu.dot_dimension_numbers<[1], [0], [0], [1], [0, 0, 1, 1], [], []>} : vector<16x16xbf16>, vector<16x16xbf16>, vector<16x16xf32> -> vector<16x16xf32>
    %16 = arith.truncf %15 : vector<16x16xf32> to vector<16x16xbf16>
    %c0_16 = arith.constant 0 : index
    %c0_17 = arith.constant 0 : index
    %17 = vector.load %arg4[%c0_16, %c0_17] : memref<16x128xbf16, #tpu.memory_space<vmem>>, vector<16x128xbf16>
    %cst_18 = arith.constant dense<0.000000e+00> : vector<16x128xf32>
    %18 = tpu.matmul %16, %17, %cst_18 {dimension_numbers = #tpu.dot_dimension_numbers<[1], [0], [0], [1], [0, 0, 1, 1], [], []>} : vector<16x16xbf16>, vector<16x128xbf16>, vector<16x128xf32> -> vector<16x128xf32>
    %c0_19 = arith.constant 0 : index
    %c0_20 = arith.constant 0 : index
    %19 = vector.load %arg5[%c0_19, %c0_20] : memref<1x128xf32, #tpu.memory_space<vmem>>, vector<1x128xf32>
    %20 = vector.broadcast %19 : vector<1x128xf32> to vector<16x128xf32>
    %21 = arith.addf %18, %20 : vector<16x128xf32>
    %c0_21 = arith.constant 0 : index
    %c0_22 = arith.constant 0 : index
    %22 = vector.load %arg6[%c0_21, %c0_22] : memref<16x128xf32, #tpu.memory_space<vmem>>, vector<16x128xf32>
    tpu.vector_store %arg6[%c0_21, %c0_22], %21 {strides = array<i32>} : memref<16x128xf32, #tpu.memory_space<vmem>>, vector<16x128xf32>,
    return
  }
}

</mosaic_0001>

<bundles_post_ra>
// kernel: tpu_custom_call.1
= control target key start
LH: loop header
LB: loop body
LE: loop exit
PB: predicated region body
PF: predicated region fallthrough
CT: control target
= control target key end

     0   :  { %11 = vsyncpa [#allocation4], 0  ;;  %s480_s0 = inlined_call_operand.vmem [shape: bf16[16,16], index: 0, kind: input, shape index: {}]   ;;  %s481_s1 = inlined_call_operand.vmem [shape: bf16[16,4], index: 1, kind: input, shape index: {}]   ;;  %s482_s2 = inlined_call_operand.hbm [shape: bf16[4,16], index: 2, kind: input, shape index: {}]   ;;  %s483_s3 = inlined_call_operand.vmem [shape: f32[1,16], index: 3, kind: input, shape index: {}]   ;;  %s484_s4 = inlined_call_operand.vmem [shape: bf16[16,128], index: 4, kind: input, shape index: {}]   ;;  %s485_s5 = inlined_call_operand.vmem [shape: f32[1,128], index: 5, kind: input, shape index: {}]   ;;  %s486_s6 = inlined_call_operand.hbm [shape: f32[16,128], index: 6, kind: output, shape index: {}]  }
   0x1   :  { %12 = vsyncpa [#allocation5], 0  ;;  %s408_s21 = smov [#allocation3]  }
   0x2   :  { %s23_s22 = sshll.u32 %s408_s21, 4  ;;  %s24_s22 = int_to_ptr.vmem [resolvable:$true] %s23_s22 }
   0x3   :  { %s372_s23 = scalar_lea.vmem %s24_s22, 32  ;;  %p377_p1 = scmp.lt.s32.totalorder %s24_s22, %s24_s22 }
   0x4   :  { %p373_p0 = scmp.ne.s32.totalorder %s24_s22, %s372_s23  ;;  %p378_p2 = scmp.lt.s32.totalorder %s372_s23, %s372_s23 }
   0x6   :  { %p379_p3 = por %p378_p2, %p377_p1 }
   0x8   :  { %p380_p4 = pnand %p379_p3, %p373_p0 }
   0xa   :  { %383 = shalt.err (!%p380_p4)
}
   0xb   :  { %26 = dma.hbm_to_vmem [thread:$0]  %s482_s2, 32, %s24_s22, [#allocation4]  }
   0xc   :  { %404 = dma.done.wait [#allocation4], 32  }
   0xd   :  { %405 = vsyncadd [#allocation4], 4294967264  ;;  %v409_v0 = vmov 0.0   ;;  %vm410_vm0 = vmmov 0   ;;  %v359_v1 = vld [vmem:[%s481_s1] sm:$0xff]   ;;  %vm52_vm1 = vcmask 130048  }
   0xe   :  { %329 = vmatprep.subr.bf16.mxu0 %v409_v0  ;;  %331 = vmatprep.mubr.msk.bf16.mxu0 %vm410_vm0, %v409_v0  ;;  %v360_v2 = vld [vmem:[%s480_s0] sm:$0xff]   ;;  %v98_v3 = vld [vmem:[#allocation3] sm:$0x3]  ;;  %vm110_vm2 = vcmask 1041408   ;;  %vm106_vm3 = vcmask 31744   ;;  %vm165_vm4 = vcmask 125952  }
   0xf   :  { %335 = vmatprep.subr.bf16.mxu1 %v409_v0  ;;  %337 = vmatprep.mubr.msk.bf16.mxu1 %vm410_vm0, %v409_v0  ;;  %v112_v4 = vsel %vm110_vm2, %v98_v3, 0  ;;  %v309_v10 = vld [vmem:[%s483_s3] ss:$0 sm:$0xff] }
  0x10   :  { %330 = vmatpush3.bf16.msra.mxu0 %v359_v1  ;;  %336 = vmatpush3.bf16.msra.mxu1 %v112_v4  ;;  %v362_v22 = vld [vmem:[%s480_s0] sm:$0xff]   ;;  %s411_s0 = smov [#allocation6]  }
  0x11   :  { %341 = vmatprep.subr.bf16.mxu0 %v409_v0  ;;  %347 = vmatprep.subr.bf16.mxu1 %v409_v0  ;;  %v363_v23 = vld [vmem:[%s484_s4] sm:$0xff]   ;;  %s294_s11 = sshll.u32 %s411_s0, 4  ;;  %s295_s11 = int_to_ptr.vmem [resolvable:$true] %s294_s11 }
  0x12   :  { %v316_v29 = vld [vmem:[%s485_s5] ss:$0 sm:$0xff]  ;;  %s384_s4 = scalar_lea.vmem %s295_s11, 256  ;;  %p389_p6 = scmp.lt.s32.totalorder %s295_s11, %s295_s11 }
  0x13   :  { %332 = vmatmul.mubr.msk.bf16.vlgmr.msra.gmra.mxu0 %vm52_vm1, %v360_v2  ;;  %p385_p5 = scmp.ne.s32.totalorder %s295_s11, %s384_s4  ;;  %p390_p7 = scmp.lt.s32.totalorder %s384_s4, %s384_s4 }
  0x14   :  { %343 = vmatprep.mubr.msk.bf16.mxu0 %vm410_vm0, %v409_v0 }
  0x15   :  { %p391_p8 = por %p390_p7, %p389_p6 }
  0x17   :  { %p392_p9 = pnand %p391_p8, %p385_p5 }
  0xd3   :  { %v90_v5 = vpop.f32.mrf.mxu0 }
  0xd5   :  { %v333_v6 = vpop.f32.mrf.mxu0 }
  0xd7   :  { %v93_v7 = vpop.f32.mrf.mxu0 }
  0xd8   :  { %v97_v8 = vpack.c.bf16 %v93_v7, %v90_v5 }
  0xd9   :  { %v334_v9 = vpop.f32.mrf.mxu0 }
  0xda   :  { %338 = vmatmul.mubr.msk.bf16.vlgmr.msra.gmra.mxu1 %vm106_vm3, %v97_v8 }
  0xdb   :  { %349 = vmatprep.mubr.msk.bf16.mxu1 %vm410_vm0, %v409_v0  ;;  %348 = vmatpush3.bf16.msra.mxu1 %v363_v23 }
 0x19a   :  { %v148_v11 = vpop.f32.mrf.mxu1 }
 0x19b   :  { %v149_v12 = vadd.f32 %v309_v10, %v148_v11 }
 0x19c   :  { %v339_v13 = vpop.f32.mrf.mxu1 }
 0x19d   :  { %v155_v14 = vmax.f32 %v149_v12, 0.0 }
 0x19e   :  { %v151_v15 = vpop.f32.mrf.mxu1 }
 0x19f   :  { %v319_v16 = vpack.c.bf16 %v155_v14, %v155_v14  ;;  %v152_v17 = vadd.f32 %v309_v10, %v151_v15 }
 0x1a0   :  { %v340_v18 = vpop.f32.mrf.mxu1 }
 0x1a1   :  { %166 = vst.msk [vmem:[#allocation2] sm:$0xf] %vm165_vm4, %v319_v16  ;;  %v156_v19 = vmax.f32 %v152_v17, 0.0 }
 0x1a3   :  { %v320_v20 = vpack.c.bf16 %v156_v19, %v156_v19 }
 0x1a5   :  { %167 = vst.msk [vmem:[#allocation2 + $0x4] sm:$0xf] %vm165_vm4, %v320_v20 }
 0x1ac   :  { %v361_v21 = vld [vmem:[#allocation2] sm:$0xff]  }
 0x1ad   :  { %342 = vmatpush3.bf16.msra.mxu0 %v361_v21 }
 0x1b0   :  { %344 = vmatmul.mubr.msk.bf16.vlgmr.msra.gmra.mxu0 %vm52_vm1, %v362_v22 }
 0x270   :  { %v220_v24 = vpop.f32.mrf.mxu0 }
 0x272   :  { %v345_v25 = vpop.f32.mrf.mxu0 }
 0x274   :  { %v223_v26 = vpop.f32.mrf.mxu0 }
 0x275   :  { %v227_v27 = vpack.c.bf16 %v223_v26, %v220_v24 }
 0x276   :  { %v346_v28 = vpop.f32.mrf.mxu0 }
 0x277   :  { %350 = vmatmul.mubr.msk.bf16.vlgmr.msra.gmra.mxu1 %vm52_vm1, %v227_v27 }
 0x337   :  { %v280_v30 = vpop.f32.mrf.mxu1 }
 0x338   :  { %v281_v31 = vadd.f32 %v316_v29, %v280_v30 }
 0x339   :  { %v351_v32 = vpop.f32.mrf.mxu1 }
 0x33a   :  { %287 = vst [vmem:[#allocation6] sm:$0xff] %v281_v31 }
 0x33b   :  { %v283_v33 = vpop.f32.mrf.mxu1 }
 0x33c   :  { %v284_v34 = vadd.f32 %v316_v29, %v283_v33 }
 0x33d   :  { %v352_v35 = vpop.f32.mrf.mxu1 }
 0x33e   :  { %288 = vst [vmem:[#allocation6 + $0x8] sm:$0xff] %v284_v34 }
 0x33f   :  { %395 = shalt.err (!%p392_p9)
}
 0x340   :  { %s412_s12 = smov 128   ;;  %s413_s5 = smov 8  }
 0x341   :  { %300 = dma.vmem_to_hbm [thread:$0]  %s295_s11, 256, %s486_s6, [#allocation5], %s412_s12, %s412_s12, %s413_s5  }
 0x342   :  { %406 = dma.done.wait [#allocation5], 256  }
 0x343   :  { %407 = vsyncadd [#allocation5], 4294967040 }
 0x344   :  { %304 = vsyncpa [#allocation4], 1 }
 0x345   :  { %305 = vsyncpa [#allocation5], 1 }

</bundles_post_ra>
